<compile_context>
chip_gen: v7x
topology: tpu7x:2x2x1
jax: 0.10.0
libtpu: 0.0.40
codegen_flags: <defaults>
</compile_context>

<pallas_src>
import functools

import jax
import jax.numpy as jnp
from jax.experimental import pallas as pl
from jax.experimental.pallas import tpu as pltpu


def _round_up(x, m):
    return ((x + m - 1) // m) * m


# ---------------------------------------------------------------------------
# Kernel body: grid = (M/tm, N/tn, K/tk); K last ("arbitrary") with f32 acc.
# ---------------------------------------------------------------------------
def _decoder_block_kernel(x_ref, w_ref, b_ref, o_ref, acc_ref):
    k = pl.program_id(2)

    @pl.when(k == 0)
    def _():
        acc_ref[...] = jnp.zeros_like(acc_ref)

    # x tile: (tm, tk); w tile: (tk, tn)  (weight already transposed to (in, out))
    acc_ref[...] += jnp.dot(x_ref[...], w_ref[...],
                            preferred_element_type=jnp.float32)

    @pl.when(k == pl.num_programs(2) - 1)
    def _():
        y = acc_ref[...] + b_ref[...]            # bias (f32)
        y = jnp.maximum(y, 0.2 * y)              # LeakyReLU(0.2)
        # Dropout (eval mode) -> identity.
        o_ref[...] = y.astype(o_ref.dtype)


# ---------------------------------------------------------------------------
# Tile selection (dims-only for tn/tk so parameters can be pre-padded once).
# ---------------------------------------------------------------------------
def _select_tiles(in_dim, out_dim, *, tm_max, tn_max, tk_max, bytes_el,
                  vmem_budget):
    Np = _round_up(out_dim, 128)
    Kp = _round_up(in_dim, 128)
    tn = min(tn_max, Np)
    tk = min(tk_max, Kp)

    # v7x has 2 TensorCores that split "parallel" grid axes: when the whole
    # batch fits one M tile (the common case), keep >= 2 N steps if possible.
    if Np >= 256:
        tn = min(tn, max(128, (Np // 2) // 128 * 128))

    def working_set(tk_, tn_):
        # double-buffered x/w/out tiles + f32 accumulator + bias
        return (2 * (tm_max * tk_ + tk_ * tn_ + tm_max * tn_) * bytes_el
                + tm_max * tn_ * 4 + 2 * tn_ * 4)

    # Shrink K, then N, to stay inside the VMEM budget (assumes largest M tile).
    while working_set(tk, tn) > vmem_budget and tk > 128:
        tk = max(128, (tk // 2) // 128 * 128)
    while working_set(tk, tn) > vmem_budget and tn > 128:
        tn = max(128, (tn // 2) // 128 * 128)
    return tn, tk


# ---------------------------------------------------------------------------
# One-time parameter preparation: hoist out of the hot path and cache.
# ---------------------------------------------------------------------------
def prepare_decoder_params(weight, bias, *, compute_dtype=jnp.bfloat16,
                           tm_max=512, tn_max=512, tk_max=2048,
                           vmem_budget_bytes=32 << 20):
    """weight: (out_dim, in_dim) PyTorch nn.Linear layout; bias: (out_dim,).

    Returns (w_kn, bias2d, out_dim, tn, tk, compute_dtype) with the weight
    transposed to (in_dim, out_dim), padded to tile multiples and cast to the
    compute dtype. Call once at init; reuse across forward calls.
    """
    out_dim, in_dim = weight.shape
    bytes_el = jnp.dtype(compute_dtype if compute_dtype is not None
                         else weight.dtype).itemsize
    tn, tk = _select_tiles(in_dim, out_dim, tm_max=tm_max, tn_max=tn_max,
                           tk_max=tk_max, bytes_el=bytes_el,
                           vmem_budget=vmem_budget_bytes)
    Kp = _round_up(in_dim, tk)
    Np = _round_up(out_dim, tn)

    w_kn = weight.T                                  # (in_dim, out_dim)
    if compute_dtype is not None:
        w_kn = w_kn.astype(compute_dtype)
    if (Kp, Np) != (in_dim, out_dim):
        w_kn = jnp.pad(w_kn, ((0, Kp - in_dim), (0, Np - out_dim)))

    bias2d = bias.reshape(1, out_dim).astype(jnp.float32)
    if Np != out_dim:
        bias2d = jnp.pad(bias2d, ((0, 0), (0, Np - out_dim)))
    return w_kn, bias2d, out_dim, tn, tk, compute_dtype


# ---------------------------------------------------------------------------
# Hot-path forward with pre-prepared parameters.
# ---------------------------------------------------------------------------
def decoder_block_prepared(x, w_kn, bias2d, out_dim, tn, tk, compute_dtype,
                           *, do_rate=0.1, tm_max=512):
    """x: (B, in_dim). w_kn/bias2d/out_dim/tn/tk from prepare_decoder_params()."""
    del do_rate  # eval-mode dropout == identity
    B, in_dim = x.shape
    Kp, Np = w_kn.shape
    out_dtype = x.dtype

    if compute_dtype is not None:
        x = x.astype(compute_dtype)

    # Whole batch in one M tile when it fits -> weight streams from HBM once.
    tm = min(tm_max, _round_up(B, 8))
    Bp = _round_up(B, tm)
    if (Bp, Kp) != (B, in_dim):
        x = jnp.pad(x, ((0, Bp - B), (0, Kp - in_dim)))

    grid = (Bp // tm, Np // tn, Kp // tk)

    # Explicit VMEM limit derived from the actual working set (double-buffered
    # x/w/out tiles + f32 accumulator), with headroom; safe on v7x's 64 MiB.
    bytes_el = jnp.dtype(x.dtype).itemsize
    vmem_est = (2 * (tm * tk + tk * tn + tm * tn) * bytes_el
                + tm * tn * 4 + 2 * tn * 4)
    vmem_limit = int(min(64 << 20, max(2 * vmem_est, 24 << 20)))

    out = pl.pallas_call(
        _decoder_block_kernel,
        out_shape=jax.ShapeDtypeStruct((Bp, Np), out_dtype),
        grid_spec=pltpu.PrefetchScalarGridSpec(
            num_scalar_prefetch=0,
            grid=grid,
            in_specs=[
                pl.BlockSpec((tm, tk), lambda i, j, k: (i, k)),   # x
                pl.BlockSpec((tk, tn), lambda i, j, k: (k, j)),   # weight (in, out)
                pl.BlockSpec((1, tn), lambda i, j, k: (0, j)),    # bias
            ],
            out_specs=pl.BlockSpec((tm, tn), lambda i, j, k: (i, j)),
            scratch_shapes=[pltpu.VMEM((tm, tn), jnp.float32)],
        ),
        compiler_params=pltpu.CompilerParams(
            dimension_semantics=("parallel", "parallel", "arbitrary"),
            vmem_limit_bytes=vmem_limit),
    )(x, w_kn, bias2d)

    return out[:B, :out_dim]


# ---------------------------------------------------------------------------
# Convenience wrapper taking raw PyTorch-layout parameters.
# For repeated calls with static parameters, hoist prepare_decoder_params()
# out of the hot path and call decoder_block_prepared() directly.
# ---------------------------------------------------------------------------
def decoder_block(x, weight, bias, do_rate=0.1, *, tm_max=512, tn_max=512,
                  tk_max=2048, compute_dtype=jnp.bfloat16):
    params = prepare_decoder_params(weight, bias, compute_dtype=compute_dtype,
                                    tm_max=tm_max, tn_max=tn_max, tk_max=tk_max)
    return decoder_block_prepared(x, *params, do_rate=do_rate, tm_max=tm_max)


def decoder_block_ref(x, weight, bias):
    y = x @ weight.T + bias
    return jnp.where(y > 0, y, 0.2 * y)


if __name__ == "__main__":
    key = jax.random.PRNGKey(0)
    k_x, k_w, k_b = jax.random.split(key, 3)

    batch, in_dim, out_dim = 8, 32, 16
    do_rate = 0.1

    x = jax.random.normal(k_x, (batch, in_dim), dtype=jnp.float32)
    # Deterministic "kaiming-uniform-like" init for the Linear layer.
    bound = 1.0 / jnp.sqrt(in_dim)
    weight = jax.random.uniform(k_w, (out_dim, in_dim), jnp.float32, -bound, bound)
    bias = jax.random.uniform(k_b, (out_dim,), jnp.float32, -bound, bound)

    ref = decoder_block_ref(x, weight, bias)

    # 1) Strict check: full-f32 operand path.
    fn_f32 = jax.jit(functools.partial(decoder_block, do_rate=do_rate,
                                       compute_dtype=jnp.float32))
    out_f32 = jax.block_until_ready(fn_f32(x, weight, bias))
    assert out_f32.shape == (batch, out_dim)
    assert jnp.allclose(out_f32, ref, atol=1e-5, rtol=1e-5), "f32 mismatch vs reference"

    # 2) Default bf16-operand path with parameters prepared once (hoisted prep).
    params = prepare_decoder_params(weight, bias)   # once, outside the hot path
    fn_bf16 = jax.jit(lambda xx: decoder_block_prepared(xx, *params, do_rate=do_rate))
    out_bf16 = jax.block_until_ready(fn_bf16(x))
    assert out_bf16.shape == (batch, out_dim)
    assert jnp.allclose(out_bf16, ref, atol=3e-2, rtol=3e-2), "bf16 mismatch vs reference"

    print("KERNEL_OK")
</pallas_src>

<mosaic_0001>
module attributes {stable_mosaic.version = 11 : i64} {
  func.func @_decoder_block_kernel(%arg0: i32, %arg1: i32, %arg2: i32, %arg3: memref<8x128xf32, #tpu.memory_space<vmem>>, %arg4: memref<128x128xf32, #tpu.memory_space<vmem>>, %arg5: memref<1x128xf32, #tpu.memory_space<vmem>>, %arg6: memref<8x128xf32, #tpu.memory_space<vmem>>, %arg7: memref<8x128xf32, #tpu.memory_space<vmem>>) attributes {dimension_semantics = [#tpu.dimension_semantics<parallel>, #tpu.dimension_semantics<parallel>, #tpu.dimension_semantics<arbitrary>], iteration_bounds = array<i64: 1, 1, 1>, scalar_prefetch = 0 : i64, scratch_operands = 1 : i64, tpu.core_type = #tpu.core_type<tc>, window_params = [{transform_indices = @transform_0, window_bounds = array<i64: 8, 128>}, {transform_indices = @transform_1, window_bounds = array<i64: 128, 128>}, {transform_indices = @transform_2, window_bounds = array<i64: 1, 128>}, {transform_indices = @transform_3, window_bounds = array<i64: 8, 128>}]} {
    %c0_i32 = arith.constant 0 : i32
    %0 = arith.cmpi eq, %arg2, %c0_i32 : i32
    %1 = arith.extui %0 : i1 to i32
    %c0_i32_0 = arith.constant 0 : i32
    %2 = arith.cmpi ne, %1, %c0_i32_0 : i32
    scf.if %2 {
      %cst_10 = arith.constant 0.000000e+00 : f32
      %12 = vector.broadcast %cst_10 : f32 to vector<8x128xf32>
      %c0_11 = arith.constant 0 : index
      %c0_12 = arith.constant 0 : index
      %13 = vector.load %arg7[%c0_11, %c0_12] : memref<8x128xf32, #tpu.memory_space<vmem>>, vector<8x128xf32>
      tpu.vector_store %arg7[%c0_11, %c0_12], %12 {strides = array<i32>} : memref<8x128xf32, #tpu.memory_space<vmem>>, vector<8x128xf32>,
    } else {
    }
    %c0 = arith.constant 0 : index
    %c0_1 = arith.constant 0 : index
    %3 = vector.load %arg7[%c0, %c0_1] : memref<8x128xf32, #tpu.memory_space<vmem>>, vector<8x128xf32>
    %c0_2 = arith.constant 0 : index
    %c0_3 = arith.constant 0 : index
    %4 = vector.load %arg3[%c0_2, %c0_3] : memref<8x128xf32, #tpu.memory_space<vmem>>, vector<8x128xf32>
    %c0_4 = arith.constant 0 : index
    %c0_5 = arith.constant 0 : index
    %5 = vector.load %arg4[%c0_4, %c0_5] : memref<128x128xf32, #tpu.memory_space<vmem>>, vector<128x128xf32>
    %cst = arith.constant dense<0.000000e+00> : vector<8x128xf32>
    %6 = tpu.matmul %4, %5, %cst {dimension_numbers = #tpu.dot_dimension_numbers<[1], [0], [0], [1], [0, 0, 1, 1], [], []>} : vector<8x128xf32>, vector<128x128xf32>, vector<8x128xf32> -> vector<8x128xf32>
    %7 = arith.addf %3, %6 : vector<8x128xf32>
    %c0_6 = arith.constant 0 : index
    %c0_7 = arith.constant 0 : index
    %8 = vector.load %arg7[%c0_6, %c0_7] : memref<8x128xf32, #tpu.memory_space<vmem>>, vector<8x128xf32>
    tpu.vector_store %arg7[%c0_6, %c0_7], %7 {strides = array<i32>} : memref<8x128xf32, #tpu.memory_space<vmem>>, vector<8x128xf32>,
    %c0_i32_8 = arith.constant 0 : i32
    %9 = arith.cmpi eq, %arg2, %c0_i32_8 : i32
    %10 = arith.extui %9 : i1 to i32
    %c0_i32_9 = arith.constant 0 : i32
    %11 = arith.cmpi ne, %10, %c0_i32_9 : i32
    scf.if %11 {
      %c0_10 = arith.constant 0 : index
      %c0_11 = arith.constant 0 : index
      %12 = vector.load %arg7[%c0_10, %c0_11] : memref<8x128xf32, #tpu.memory_space<vmem>>, vector<8x128xf32>
      %c0_12 = arith.constant 0 : index
      %c0_13 = arith.constant 0 : index
      %13 = vector.load %arg5[%c0_12, %c0_13] : memref<1x128xf32, #tpu.memory_space<vmem>>, vector<1x128xf32>
      %14 = vector.broadcast %13 : vector<1x128xf32> to vector<8x128xf32>
      %15 = arith.addf %12, %14 : vector<8x128xf32>
      %cst_14 = arith.constant 2.000000e-01 : f32
      %16 = vector.broadcast %cst_14 : f32 to vector<8x128xf32>
      %17 = arith.mulf %16, %15 : vector<8x128xf32>
      %18 = arith.maximumf %15, %17 : vector<8x128xf32>
      %c0_15 = arith.constant 0 : index
      %c0_16 = arith.constant 0 : index
      %19 = vector.load %arg6[%c0_15, %c0_16] : memref<8x128xf32, #tpu.memory_space<vmem>>, vector<8x128xf32>
      tpu.vector_store %arg6[%c0_15, %c0_16], %18 {strides = array<i32>} : memref<8x128xf32, #tpu.memory_space<vmem>>, vector<8x128xf32>,
    } else {
    }
    return
  }
  func.func @transform_0(%arg0: i32, %arg1: i32, %arg2: i32) -> (i32, i32) {
    %c0_i32 = arith.constant 0 : i32
    return %arg0, %arg2 : i32, i32
  }
  func.func @transform_1(%arg0: i32, %arg1: i32, %arg2: i32) -> (i32, i32) {
    %c0_i32 = arith.constant 0 : i32
    return %arg2, %arg1 : i32, i32
  }
  func.func @transform_2(%arg0: i32, %arg1: i32, %arg2: i32) -> (i32, i32) {
    %c0_i32 = arith.constant 0 : i32
    %c0_i32_0 = arith.constant 0 : i32
    return %c0_i32, %arg1 : i32, i32
  }
  func.func @transform_3(%arg0: i32, %arg1: i32, %arg2: i32) -> (i32, i32) {
    %c0_i32 = arith.constant 0 : i32
    return %arg0, %arg1 : i32, i32
  }
}

</mosaic_0001>

<bundles_post_ra>
// kernel: decoder_block.1
= control target key start
LH: loop header
LB: loop body
LE: loop exit
PB: predicated region body
PF: predicated region fallthrough
CT: control target
= control target key end

     0   :  { %v244_v3 = vmov 0.0|0.0   ;;  %vm245_vm0 = vmmov 0   ;;  %v246_v6 = vmov 0.0   ;;  %s334_s0 = inlined_call_operand.vmem [shape: f32[8,128], index: 0, kind: input, shape index: {}]   ;;  %s335_s1 = inlined_call_operand.vmem [shape: f32[128,128], index: 1, kind: input, shape index: {}]   ;;  %s336_s2 = inlined_call_operand.vmem [shape: f32[1,128], index: 2, kind: input, shape index: {}]   ;;  %s337_s3 = inlined_call_operand.hbm [shape: f32[8,128], index: 3, kind: output, shape index: {}]  }
   0x1   :  { %v22_v0 = vld [vmem:[%s335_s1] sm:$0xff]  ;;  %v23_v1 = vld [vmem:[%s335_s1 + $0x8] sm:$0xff]  ;;  %v24_v2 = vld [vmem:[%s335_s1 + $0x10] sm:$0xff]  ;;  %192 = vmatprep.subr.bf16.mxu0 %v244_v3  ;;  %189 = vmatprep.mubr.msk.f32.mxu0 %vm245_vm0, %v246_v6 }
   0x2   :  { %v193_v4 = vpack.c.bf16 %v23_v1, %v22_v0  ;;  %v25_v5 = vld [vmem:[%s335_s1 + $0x18] sm:$0xff]  ;;  %v26_v8 = vld [vmem:[%s335_s1 + $0x20] sm:$0xff]  ;;  %v27_v9 = vld [vmem:[%s335_s1 + $0x28] sm:$0xff] }
   0x3   :  { %v196_v7 = vpack.c.bf16 %v25_v5, %v24_v2 }
   0x4   :  { %194 = vmatpush3.bf16.msra.mxu0 %v193_v4 }
   0x5   :  { %195 = vmatprep.subr.bf16.mxu0 %v244_v3 }
   0x6   :  { %8 = vsyncpa [#allocation4], 0  ;;  %v199_v10 = vpack.c.bf16 %v27_v9, %v26_v8  ;;  %v28_v11 = vld [vmem:[%s335_s1 + $0x30] sm:$0xff]  ;;  %v29_v12 = vld [vmem:[%s335_s1 + $0x38] sm:$0xff]  ;;  %s247_s21 = smov [#allocation3]  }
   0x7   :  { %v202_v13 = vpack.c.bf16 %v29_v12, %v28_v11  ;;  %v30_v14 = vld [vmem:[%s335_s1 + $0x40] sm:$0xff]  ;;  %v31_v15 = vld [vmem:[%s335_s1 + $0x48] sm:$0xff]  ;;  %v32_v17 = vld [vmem:[%s335_s1 + $0x50] sm:$0xff]  ;;  %s131_s22 = sshll.u32 %s247_s21, 4  ;;  %s132_s22 = int_to_ptr.vmem [resolvable:$true] %s131_s22 }
   0x8   :  { %197 = vmatpush3.bf16.msra.mxu0 %v196_v7  ;;  %v205_v16 = vpack.c.bf16 %v31_v15, %v30_v14  ;;  %v33_v18 = vld [vmem:[%s335_s1 + $0x58] sm:$0xff]  ;;  %v34_v20 = vld [vmem:[%s335_s1 + $0x60] sm:$0xff]  ;;  %v35_v21 = vld [vmem:[%s335_s1 + $0x68] sm:$0xff]  ;;  %p225_p1 = scmp.lt.s32.totalorder %s132_s22, %s132_s22 }
   0x9   :  { %198 = vmatprep.subr.bf16.mxu0 %v244_v3  ;;  %v208_v19 = vpack.c.bf16 %v33_v18, %v32_v17  ;;  %v211_v22 = vpack.c.bf16 %v35_v21, %v34_v20  ;;  %v36_v23 = vld [vmem:[%s335_s1 + $0x70] sm:$0xff]  ;;  %v37_v24 = vld [vmem:[%s335_s1 + $0x78] sm:$0xff]  ;;  %v21_v26 = vld [vmem:[%s334_s0] sm:$0xff]  ;;  %s220_s1 = scalar_lea.vmem %s132_s22, 128 }
   0xa   :  { %v214_v25 = vpack.c.bf16 %v37_v24, %v36_v23  ;;  %v139_v27 = vld [vmem:[%s336_s2] ss:$0 sm:$0xff]  ;;  %p221_p0 = scmp.ne.s32.totalorder %s132_s22, %s220_s1  ;;  %p226_p2 = scmp.lt.s32.totalorder %s220_s1, %s220_s1 }
   0xc   :  { %200 = vmatpush3.bf16.msra.mxu0 %v199_v10  ;;  %p227_p3 = por %p226_p2, %p225_p1 }
   0xd   :  { %201 = vmatprep.subr.bf16.mxu0 %v244_v3 }
   0xe   :  { %p228_p4 = pnand %p227_p3, %p221_p0 }
  0x10   :  { %203 = vmatpush3.bf16.msra.mxu0 %v202_v13 }
  0x11   :  { %204 = vmatprep.subr.bf16.mxu0 %v244_v3 }
  0x14   :  { %206 = vmatpush3.bf16.msra.mxu0 %v205_v16 }
  0x15   :  { %207 = vmatprep.subr.bf16.mxu0 %v244_v3 }
  0x18   :  { %209 = vmatpush3.bf16.msra.mxu0 %v208_v19 }
  0x19   :  { %210 = vmatprep.subr.bf16.mxu0 %v244_v3 }
  0x1c   :  { %212 = vmatpush3.bf16.msra.mxu0 %v211_v22 }
  0x1d   :  { %213 = vmatprep.subr.bf16.mxu0 %v244_v3 }
  0x20   :  { %215 = vmatpush3.bf16.msra.mxu0 %v214_v25 }
  0x23   :  { %190 = vmatmul.mubr.f32.vlgmr.msra.gmra.mrb[0].mxu0 %v21_v26 }
  0xf6   :  { %v104_v28 = vpop.f32.mrb[0].mxu0 }
  0xf7   :  { %v121_v29 = vadd.f32 %v139_v27, %v104_v28  ;;  %v191_v30 = vpop.f32.mrb[1].mxu0 }
  0xf9   :  { %v122_v31 = vmul.f32 0.2, %v121_v29 }
  0xfb   :  { %v123_v32 = vmax.f32 %v121_v29, %v122_v31 }
  0xfd   :  { %124 = vst [vmem:[#allocation3] sm:$0xff] %v123_v32 }
  0xfe   :  { %231 = shalt.err (!%p228_p4)
}
  0xff   :  { %s232_s2 = scalar_lea.hbm %s337_s3, 128 }
 0x100   :  { %p233_p5 = scmp.ne.s32.totalorder %s337_s3, %s232_s2  ;;  %p236_p6 = scmp.lt.u32.totalorder %s232_s2, %s337_s3 }
 0x102   :  { %p238_p7 = pnand %p236_p6, %p233_p5 }
 0x104   :  { %241 = shalt.err (!%p238_p7)
}
 0x105   :  { %134 = dma.vmem_to_hbm [thread:$0]  %s132_s22, 128, %s337_s3, [#allocation4]  }
 0x106   :  { %242 = dma.done.wait [#allocation4], 128  }
 0x107   :  { %243 = vsyncadd [#allocation4], 4294967168 }
 0x108   :  { %138 = vsyncpa [#allocation4], 1 }

</bundles_post_ra>
